<compile_context>
chip_gen: v6e
topology: v6e:2x2x1
jax: 0.10.0
libtpu: 0.0.40
codegen_flags: <defaults>
</compile_context>

<pallas_src>
import functools

import jax
import jax.numpy as jnp
from jax.experimental import pallas as pl
from jax.experimental.pallas import tpu as pltpu

_MiB = 1024 * 1024


def _round_up(x: int, m: int) -> int:
    return ((x + m - 1) // m) * m


def _cdiv(a: int, b: int) -> int:
    return -(-a // b)


def _tpu_vmem_capacity_bytes() -> int:
    """Physical VMEM per TensorCore; conservative (v7x-sized) fallback."""
    try:
        info = pltpu.get_tpu_info()
        cap = getattr(info, "vmem_capacity_bytes", None)
        if cap:
            return int(cap)
    except Exception:
        pass
    return 64 * _MiB


def _num_tensorcores() -> int:
    """TensorCores sharing one pallas grid (2 on v7x). Defaults to 1 if unknown."""
    cores = 1
    try:
        info = pltpu.get_tpu_info()
        for attr in ("num_cores", "tensorcores_per_chip", "num_tensorcores",
                     "cores_per_chip"):
            v = getattr(info, attr, None)
            if v:
                cores = int(v)
                break
    except Exception:
        pass
    if cores <= 1:
        try:
            cores = max(1, int(getattr(jax.devices()[0], "num_cores", 1)))
        except Exception:
            cores = 1
    return max(1, min(cores, 8))


def _choose_tile_b(batch: int, dim: int, itemsize: int,
                   budget_bytes: int, num_cores: int) -> int:
    """Largest multiple-of-8 batch tile whose pipeline buffers fit the budget.

    Layout-aware: a [tile_b, D] VMEM block costs tile_b * round_up(D, 128) *
    itemsize bytes (lane padding) and the (tile_b, 1) f32 output column costs
    tile_b * 128 * 4.  Inputs and output are double-buffered by the pipeline.
    """
    d_pad = _round_up(dim, 128)
    per_row = 3 * 2 * d_pad * itemsize + 2 * 128 * 4
    cap = max(8, (budget_bytes // per_row) // 8 * 8)
    b_pad8 = _round_up(max(batch, 8), 8)
    tile = min(cap, b_pad8)
    # Only on multi-TensorCore chips (v7x): make the step count a multiple of
    # the core count so the "parallel" axis load-balances.  Single-core chips
    # (v5e/v6e) keep the largest tile (fewest grid steps).
    if num_cores > 1 and b_pad8 >= 8 * num_cores:
        n_tiles = max(num_cores, _round_up(_cdiv(b_pad8, tile), num_cores))
        tile = min(tile, _round_up(_cdiv(b_pad8, n_tiles), 8))
    return max(8, (tile // 8) * 8)


def _transe_kernel(h_ref, r_ref, t_ref, o_ref, *, l1: bool):
    """One batch tile: res = t - h - r ; o = ||res||_p along the lane axis."""
    res = (t_ref[...].astype(jnp.float32)
           - h_ref[...].astype(jnp.float32)
           - r_ref[...].astype(jnp.float32))
    if l1:
        o_ref[...] = jnp.sum(jnp.abs(res), axis=1, keepdims=True)
    else:
        # sqrt rides the EUP slot; the reduction is an XLU lane-reduce.
        o_ref[...] = jnp.sqrt(jnp.sum(res * res, axis=1, keepdims=True))


def transe_forward(en_emb, rel_emb, h_batch, r_batch, t_batch,
                   *, l1: bool = False, tile_b: int | None = None):
    """TransE score. en_emb: [E, D], rel_emb: [R, D], index batches: [B] ints.

    Returns float32 [B] (== torch.norm(t_em - h_em - r_em, p, dim=1)).
    Embedding tables may be float32 or bfloat16; math is done in f32.
    """
    D = en_emb.shape[1]
    B = int(h_batch.shape[0])
    itemsize = jnp.dtype(en_emb.dtype).itemsize

    vmem_capacity = _tpu_vmem_capacity_bytes()
    # v5e/v6e (128 MiB physical) can take a 64 MiB scoped limit; stay at 32 MiB
    # on v7x (64 MiB physical per TensorCore) or when the chip is unknown.
    vmem_limit = 64 * _MiB if vmem_capacity >= 128 * _MiB else 32 * _MiB
    budget = (vmem_limit * 3) // 4          # headroom for internal scratch
    num_cores = _num_tensorcores()

    if tile_b is None:
        tile_b = _choose_tile_b(B, D, itemsize, budget, num_cores)
    tile_b = max(8, (tile_b // 8) * 8)

    # Pad the batch so the grid divides evenly; padded rows gather row 0 and
    # are sliced off below (numerically harmless, <= tile_b - 1 extra rows).
    n_tiles = _cdiv(B, tile_b)
    b_pad = n_tiles * tile_b
    pad = b_pad - B
    if pad:
        h_batch = jnp.pad(h_batch, (0, pad))
        r_batch = jnp.pad(r_batch, (0, pad))
        t_batch = jnp.pad(t_batch, (0, pad))

    # Embedding lookups (gather).  allow_input_fusion below lets XLA fuse these
    # producers into the pallas_call operands instead of materializing three
    # [b_pad, D] intermediates in HBM that the kernel would re-read.
    h_em = jnp.take(en_emb, h_batch, axis=0)   # [b_pad, D]
    r_em = jnp.take(rel_emb, r_batch, axis=0)  # [b_pad, D]
    t_em = jnp.take(en_emb, t_batch, axis=0)   # [b_pad, D]

    kernel = functools.partial(_transe_kernel, l1=l1)
    out = pl.pallas_call(
        kernel,
        out_shape=jax.ShapeDtypeStruct((b_pad, 1), jnp.float32),
        grid=(n_tiles,),
        in_specs=[
            pl.BlockSpec((tile_b, D), lambda i: (i, 0)),  # h_em
            pl.BlockSpec((tile_b, D), lambda i: (i, 0)),  # r_em
            pl.BlockSpec((tile_b, D), lambda i: (i, 0)),  # t_em
        ],
        out_specs=pl.BlockSpec((tile_b, 1), lambda i: (i, 0)),
        compiler_params=pltpu.CompilerParams(
            dimension_semantics=("parallel",),
            vmem_limit_bytes=vmem_limit,
            allow_input_fusion=[True, True, True]),
    )(h_em, r_em, t_em)
    return out[:B, 0]


def xavier_uniform(key, shape, dtype=jnp.float32):
    """Deterministic Xavier/Glorot uniform init (matches nn.init.xavier_uniform)."""
    fan_in, fan_out = shape[1], shape[0]
    limit = jnp.sqrt(6.0 / (fan_in + fan_out))
    return jax.random.uniform(key, shape, dtype, minval=-limit, maxval=limit)


if __name__ == "__main__":
    # Small, deterministic problem consistent with the module's __init__.
    en_count, rel_count, dimension = 32, 8, 32
    batch = 16

    key = jax.random.PRNGKey(0)
    k_en, k_rel, k_h, k_r, k_t = jax.random.split(key, 5)

    en_embedding = xavier_uniform(k_en, (en_count, dimension))
    rel_embedding = xavier_uniform(k_rel, (rel_count, dimension))

    h_batch = jax.random.randint(k_h, (batch,), 0, en_count, dtype=jnp.int32)
    r_batch = jax.random.randint(k_r, (batch,), 0, rel_count, dtype=jnp.int32)
    t_batch = jax.random.randint(k_t, (batch,), 0, en_count, dtype=jnp.int32)

    # L2 (default) and L1 scores via the Pallas kernel.
    score_l2 = transe_forward(en_embedding, rel_embedding,
                              h_batch, r_batch, t_batch, l1=False)
    score_l1 = transe_forward(en_embedding, rel_embedding,
                              h_batch, r_batch, t_batch, l1=True)
    # Batch that is NOT a multiple of the tile (padding path).
    score_odd = transe_forward(en_embedding, rel_embedding,
                               h_batch[:13], r_batch[:13], t_batch[:13],
                               l1=False)
    # bf16 tables (halved HBM bytes); kernel upcasts to f32 internally.
    en_bf = en_embedding.astype(jnp.bfloat16)
    rel_bf = rel_embedding.astype(jnp.bfloat16)
    score_bf16 = transe_forward(en_bf, rel_bf, h_batch, r_batch, t_batch,
                                l1=False)
    jax.block_until_ready((score_l2, score_l1, score_odd, score_bf16))

    # Pure-JAX reference checks (f32 parity path).
    h_em = jnp.take(en_embedding, h_batch, axis=0)
    r_em = jnp.take(rel_embedding, r_batch, axis=0)
    t_em = jnp.take(en_embedding, t_batch, axis=0)
    res = t_em - h_em - r_em
    ref_l2 = jnp.sqrt(jnp.sum(res * res, axis=1))
    ref_l1 = jnp.sum(jnp.abs(res), axis=1)

    # bf16 reference: same f32 math on the bf16 rows (exact parity with kernel).
    res_bf = (jnp.take(en_bf, t_batch, axis=0).astype(jnp.float32)
              - jnp.take(en_bf, h_batch, axis=0).astype(jnp.float32)
              - jnp.take(rel_bf, r_batch, axis=0).astype(jnp.float32))
    ref_bf16 = jnp.sqrt(jnp.sum(res_bf * res_bf, axis=1))

    assert score_l2.shape == (batch,) and score_l1.shape == (batch,)
    assert score_odd.shape == (13,) and score_bf16.shape == (batch,)
    assert jnp.allclose(score_l2, ref_l2, atol=1e-5, rtol=1e-5)
    assert jnp.allclose(score_l1, ref_l1, atol=1e-5, rtol=1e-5)
    assert jnp.allclose(score_odd, ref_l2[:13], atol=1e-5, rtol=1e-5)
    assert jnp.allclose(score_bf16, ref_bf16, atol=1e-5, rtol=1e-5)

    print("KERNEL_OK")
</pallas_src>

<mosaic_0001>
module attributes {stable_mosaic.version = 11 : i64} {
  func.func @_transe_kernel(%arg0: i32, %arg1: memref<16x32xf32, #tpu.memory_space<vmem>>, %arg2: memref<16x32xf32, #tpu.memory_space<vmem>>, %arg3: memref<16x32xf32, #tpu.memory_space<vmem>>, %arg4: memref<16x1xf32, #tpu.memory_space<vmem>>) attributes {dimension_semantics = [#tpu.dimension_semantics<parallel>], iteration_bounds = array<i64: 1>, scalar_prefetch = 0 : i64, scratch_operands = 0 : i64, tpu.core_type = #tpu.core_type<tc>, window_params = [{transform_indices = @transform_0, window_bounds = array<i64: 16, 32>}, {transform_indices = @transform_1, window_bounds = array<i64: 16, 32>}, {transform_indices = @transform_2, window_bounds = array<i64: 16, 32>}, {transform_indices = @transform_3, window_bounds = array<i64: 16, 1>}]} {
    %c0 = arith.constant 0 : index
    %c0_0 = arith.constant 0 : index
    %0 = vector.load %arg3[%c0, %c0_0] : memref<16x32xf32, #tpu.memory_space<vmem>>, vector<16x32xf32>
    %c0_1 = arith.constant 0 : index
    %c0_2 = arith.constant 0 : index
    %1 = vector.load %arg1[%c0_1, %c0_2] : memref<16x32xf32, #tpu.memory_space<vmem>>, vector<16x32xf32>
    %2 = arith.subf %0, %1 : vector<16x32xf32>
    %c0_3 = arith.constant 0 : index
    %c0_4 = arith.constant 0 : index
    %3 = vector.load %arg2[%c0_3, %c0_4] : memref<16x32xf32, #tpu.memory_space<vmem>>, vector<16x32xf32>
    %4 = arith.subf %2, %3 : vector<16x32xf32>
    %5 = arith.mulf %4, %4 : vector<16x32xf32>
    %cst = arith.constant dense<0.000000e+00> : vector<16xf32>
    %6 = vector.multi_reduction <add>, %5, %cst [1] : vector<16x32xf32> to vector<16xf32>
    %7 = vector.shape_cast %6 : vector<16xf32> to vector<16x1xf32>
    %8 = math.sqrt %7 : vector<16x1xf32>
    %c0_5 = arith.constant 0 : index
    %c0_6 = arith.constant 0 : index
    %9 = vector.load %arg4[%c0_5, %c0_6] : memref<16x1xf32, #tpu.memory_space<vmem>>, vector<16x1xf32>
    tpu.vector_store %arg4[%c0_5, %c0_6], %8 {strides = array<i32>} : memref<16x1xf32, #tpu.memory_space<vmem>>, vector<16x1xf32>,
    return
  }
  func.func @transform_0(%arg0: i32) -> (i32, i32) {
    %c0_i32 = arith.constant 0 : i32
    %c0_i32_0 = arith.constant 0 : i32
    return %arg0, %c0_i32 : i32, i32
  }
  func.func @transform_1(%arg0: i32) -> (i32, i32) {
    %c0_i32 = arith.constant 0 : i32
    %c0_i32_0 = arith.constant 0 : i32
    return %arg0, %c0_i32 : i32, i32
  }
  func.func @transform_2(%arg0: i32) -> (i32, i32) {
    %c0_i32 = arith.constant 0 : i32
    %c0_i32_0 = arith.constant 0 : i32
    return %arg0, %c0_i32 : i32, i32
  }
  func.func @transform_3(%arg0: i32) -> (i32, i32) {
    %c0_i32 = arith.constant 0 : i32
    %c0_i32_0 = arith.constant 0 : i32
    return %arg0, %c0_i32 : i32, i32
  }
}

</mosaic_0001>

<bundles_post_ra>
// kernel: tpu_custom_call.1
= control target key start
LH: loop header
LB: loop body
LE: loop exit
PB: predicated region body
PF: predicated region fallthrough
CT: control target
= control target key end

     0   :  { %8 = vsyncpa [#allocation3], 0  ;;  %s210_s0 = inlined_call_operand.hbm [shape: f32[16,32], index: 0, kind: input, shape index: {}]   ;;  %s211_s1 = inlined_call_operand.hbm [shape: f32[16,32], index: 1, kind: input, shape index: {}]   ;;  %s212_s2 = inlined_call_operand.hbm [shape: f32[16,32], index: 2, kind: input, shape index: {}]   ;;  %s213_s3 = inlined_call_operand.vmem [shape: f32[16,1], index: 3, kind: output, shape index: {}]  }
   0x1   :  { %9 = vsyncpa [#allocation5], 0  ;;  %s170_s12 = smov [#allocation4]   ;;  %s171_s14 = smov [#allocation2]  }
   0x2   :  { %s27_s13 = sshll.u32 %s170_s12, 4  ;;  %s15_s15 = sshll.u32 %s171_s14, 4  ;;  %s28_s13 = int_to_ptr.vmem [resolvable:$true] %s27_s13  ;;  %s16_s15 = int_to_ptr.vmem [resolvable:$true] %s15_s15 }
   0x3   :  { %s114_s16 = scalar_lea.vmem %s28_s13, 256  ;;  %p119_p1 = scmp.lt.s32.totalorder %s28_s13, %s28_s13 }
   0x4   :  { %p115_p0 = scmp.ne.s32.totalorder %s28_s13, %s114_s16  ;;  %p120_p2 = scmp.lt.s32.totalorder %s114_s16, %s114_s16 }
   0x6   :  { %p121_p3 = por %p120_p2, %p119_p1 }
   0x8   :  { %p122_p4 = pnand %p121_p3, %p115_p0 }
   0xa   :  { %125 = shalt.err (!%p122_p4)
}
   0xb   :  { %s172_s17 = smov 128   ;;  %s173_s18 = smov 8  }
   0xc   :  { %33 = dma.hbm_to_vmem [thread:$0]  %s211_s1, 256, %s28_s13, [#allocation5], %s172_s17, %s172_s17, %s173_s18  }
   0xd   :  { %s134_s21 = scalar_lea.vmem %s16_s15, 256  ;;  %p139_p6 = scmp.lt.s32.totalorder %s16_s15, %s16_s15 }
   0xe   :  { %p135_p5 = scmp.ne.s32.totalorder %s16_s15, %s134_s21  ;;  %p140_p7 = scmp.lt.s32.totalorder %s134_s21, %s134_s21 }
  0x10   :  { %p141_p8 = por %p140_p7, %p139_p6 }
  0x12   :  { %p142_p9 = pnand %p141_p8, %p135_p5 }
  0x14   :  { %145 = shalt.err (!%p142_p9)
}
  0x15   :  { %21 = dma.hbm_to_vmem [thread:$0]  %s210_s0, 256, %s16_s15, [#allocation3], %s172_s17, %s172_s17, %s173_s18  }
  0x16   :  { %s174_s24 = smov [#allocation6]  }
  0x17   :  { %s39_s25 = sshll.u32 %s174_s24, 4  ;;  %s40_s25 = int_to_ptr.vmem [resolvable:$true] %s39_s25 }
  0x18   :  { %s154_s26 = scalar_lea.vmem %s40_s25, 256  ;;  %p159_p11 = scmp.lt.s32.totalorder %s40_s25, %s40_s25 }
  0x19   :  { %p155_p10 = scmp.ne.s32.totalorder %s40_s25, %s154_s26  ;;  %p160_p12 = scmp.lt.s32.totalorder %s154_s26, %s154_s26 }
  0x1b   :  { %p161_p13 = por %p160_p12, %p159_p11 }
  0x1d   :  { %p162_p0 = pnand %p161_p13, %p155_p10 }
  0x1f   :  { %165 = shalt.err (!%p162_p0)
}
  0x20   :  { %45 = dma.hbm_to_vmem [thread:$0]  %s212_s2, 256, %s40_s25, [#allocation5], %s172_s17, %s172_s17, %s173_s18  }
  0x21   :  { %166 = dma.done.wait [#allocation3], 256  }
  0x22   :  { %167 = vsyncadd [#allocation3], 4294967040 }
  0x23   :  { %168 = dma.done.wait [#allocation5], 512  }
  0x24   :  { %169 = vsyncadd [#allocation5], 4294966784  ;;  %v55_v0 = vld [vmem:[#allocation6] sm:$0xff]  ;;  %v61_v2 = vld [vmem:[#allocation4] sm:$0xff]  ;;  %vm67_vm0 = vcmask 261120   ;;  %vm88_vm2 = vcmask 7168  }
  0x25   :  { %v57_v1 = vld [vmem:[#allocation2] sm:$0xff]  ;;  %v56_v4 = vld [vmem:[#allocation6 + $0x8] sm:$0xff]  ;;  %v62_v6 = vld [vmem:[#allocation4 + $0x8] sm:$0xff] }
  0x26   :  { %v59_v3 = vsub.f32 %v55_v0, %v57_v1  ;;  %v58_v5 = vld [vmem:[#allocation2 + $0x8] sm:$0xff] }
  0x27   :  { %v60_v7 = vsub.f32 %v56_v4, %v58_v5 }
  0x28   :  { %v63_v8 = vsub.f32 %v59_v3, %v61_v2 }
  0x29   :  { %v64_v9 = vsub.f32 %v60_v7, %v62_v6 }
  0x2a   :  { %v65_v10 = vmul.f32 %v63_v8, %v63_v8 }
  0x2b   :  { %v66_v11 = vmul.f32 %v64_v9, %v64_v9 }
  0x2c   :  { %v68_v12 = vsel %vm67_vm0, %v65_v10, 0.0 }
  0x2d   :  { %69 = vadd.xlane.f32.xlu0 %v68_v12  ;;  %v71_v13 = vsel %vm67_vm0, %v66_v11, 0.0 }
  0x31   :  { %72 = vadd.xlane.f32.xlu0 %v71_v13 }
  0xb6   :  { %v70_v14 = vpop.xlane.xlu0 %69 }
  0xb7   :  { %102 = vrsqrt.f32 %v70_v14  ;;  %vm76_vm1 = vcmp.eq.f32.partialorder %v70_v14, inf  ;;  %v79_v18 = vand.u32 2147483648, %v70_v14  ;;  %vm78_vm3 = vcmp.eq.f32.partialorder %v70_v14, 0.0 }
  0xba   :  { %v73_v15 = vpop.xlane.xlu0 %72 }
  0xbb   :  { %104 = vrsqrt.f32 %v73_v15  ;;  %vm83_vm4 = vcmp.eq.f32.partialorder %v73_v15, inf  ;;  %v86_v23 = vand.u32 2147483648, %v73_v15  ;;  %vm85_vm5 = vcmp.eq.f32.partialorder %v73_v15, 0.0 }
  0xc4   :  { %v103_v16 = vpop.eup %102 }
  0xc5   :  { %v75_v17 = vmul.f32 %v103_v16, %v70_v14 }
  0xc7   :  { %v77_v19 = vsel %vm76_vm1, %v70_v14, %v75_v17 }
  0xc8   :  { %v105_v20 = vpop.eup %104  ;;  %v80_v21 = vsel %vm78_vm3, %v79_v18, %v77_v19 }
  0xc9   :  { %89 = vst.msk [vmem:[%s213_s3] sm:$0xff] %vm88_vm2, %v80_v21  ;;  %v82_v22 = vmul.f32 %v105_v20, %v73_v15 }
  0xcb   :  { %v84_v24 = vsel %vm83_vm4, %v73_v15, %v82_v22 }
  0xcc   :  { %v87_v25 = vsel %vm85_vm5, %v86_v23, %v84_v24 }
  0xcd   :  { %90 = vst.msk [vmem:[%s213_s3 + $0x8] sm:$0xff] %vm88_vm2, %v87_v25 }
  0xce   :  { %95 = vsyncpa [#allocation3], 1 }
  0xcf   :  { %96 = vsyncpa [#allocation5], 1 }

</bundles_post_ra>
